<compile_context>
chip_gen: v7x
topology: tpu7x:2x2x1
jax: 0.10.0
libtpu: 0.0.40
codegen_flags: <defaults>
</compile_context>

<pallas_src>
import jax
import jax.numpy as jnp
from jax.experimental import pallas as pl
from jax.experimental.pallas import tpu as pltpu

H1 = 128        # first hidden size (already a full 128-lane tile)
H2 = 64         # second hidden size in the PyTorch module
H2_PAD = 128    # zero-padded hidden-2 width (lane-dense intermediates)


def _round_up(x, m):
    return ((x + m - 1) // m) * m


def _pick_batch_tile(B):
    """Batch tile policy: multiples of 16, enough grid steps for pipelining.

    - B <= 256: single step (per-step overhead dominates at tiny batches).
    - 256 < B <= 512: two steps so both v7x TensorCores get a tile.
    - B > 512: >= 4 steps so each core keeps >=2 steps of double-buffered
      DMA/compute overlap; tile floor 256, cap 2048 (VMEM is a non-issue).
    """
    if B <= 256:
        return B
    if B <= 512:
        return _round_up(pl.cdiv(B, 2), 16)
    return max(256, min(_round_up(pl.cdiv(B, 4), 16), 2048))


def mlp_kernel(x_ref, w1_ref, b1_ref, w2_ref, b2_ref, w3_ref, b3_ref, o_ref):
    dot_dtype = w1_ref.dtype
    # Layer 1: Linear + ReLU (MXU matmul, f32 accumulate; epilogue in f32).
    # x arrives f32 from HBM; cast to the dot dtype in-kernel (no wrapper op).
    h1 = jnp.dot(x_ref[...].astype(dot_dtype), w1_ref[...],
                 preferred_element_type=jnp.float32)
    h1 = jnp.maximum(h1 + b1_ref[...], 0.0)
    # Layer 2: Linear + ReLU (H2 zero-padded to 128 lanes -> lane-dense).
    h2 = jnp.dot(h1.astype(dot_dtype), w2_ref[...],
                 preferred_element_type=jnp.float32)
    h2 = jnp.maximum(h2 + b2_ref[...], 0.0)
    # Layer 3: Linear (Q-values), unpadded (tb, out_c) store.
    out = jnp.dot(h2.astype(dot_dtype), w3_ref[...],
                  preferred_element_type=jnp.float32)
    o_ref[...] = (out + b3_ref[...]).astype(o_ref.dtype)


def prepare_params(params, dot_dtype=jnp.bfloat16):
    """One-time: pad H2 (64->128) with exact zeros and cast weights to the dot
    dtype. ReLU(0)=0 and zero w3 rows keep results bit-identical to unpadded.
    Biases stay f32 (epilogue adds are f32)."""
    w1, b1, w2, b2, w3, b3 = (params[k] for k in ("w1", "b1", "w2", "b2", "w3", "b3"))
    in_c = w1.shape[0]
    out_c = w3.shape[1]
    w2p = jnp.zeros((H1, H2_PAD), jnp.float32).at[:, :H2].set(w2)
    b2p = jnp.zeros((1, H2_PAD), jnp.float32).at[:, :H2].set(b2)
    w3p = jnp.zeros((H2_PAD, out_c), jnp.float32).at[:H2, :].set(w3)
    return {
        "w1": w1.astype(dot_dtype),
        "b1": b1,
        "w2": w2p.astype(dot_dtype),
        "b2": b2p,
        "w3": w3p.astype(dot_dtype),
        "b3": b3,
        "in_c": in_c,
        "out_c": out_c,
        "dot_dtype": jnp.dtype(dot_dtype),
    }


def net_forward(x, prep, *, batch_tile=None):
    """Fused MLP forward. x: (B, in_c) f32. prep: output of prepare_params()."""
    B, in_c = x.shape
    assert in_c == prep["in_c"]
    out_c = prep["out_c"]

    tb = _pick_batch_tile(B) if batch_tile is None else batch_tile
    grid = (pl.cdiv(B, tb),)

    # Batch axis tiled across the grid; weights/biases are resident (block 0).
    in_specs = [
        pl.BlockSpec((tb, in_c), lambda i: (i, 0)),        # x tile (f32)
        pl.BlockSpec((in_c, H1), lambda i: (0, 0)),        # w1 (dot dtype)
        pl.BlockSpec((1, H1), lambda i: (0, 0)),           # b1 (f32)
        pl.BlockSpec((H1, H2_PAD), lambda i: (0, 0)),      # w2 (padded, dot dtype)
        pl.BlockSpec((1, H2_PAD), lambda i: (0, 0)),       # b2 (f32, padded)
        pl.BlockSpec((H2_PAD, out_c), lambda i: (0, 0)),   # w3 (padded K, dot dtype)
        pl.BlockSpec((1, out_c), lambda i: (0, 0)),        # b3 (f32)
    ]
    # Unpadded output block: last dim == full array dim, so layout is legal;
    # the masked tb x out_c store is negligible vs a 128-lane f32 writeback.
    out_spec = pl.BlockSpec((tb, out_c), lambda i: (i, 0))

    dsize = prep["dot_dtype"].itemsize
    flops = 2 * B * (in_c * H1 + H1 * H2_PAD + H2_PAD * out_c)
    bytes_accessed = (
        B * in_c * 4 + B * out_c * 4
        + (in_c * H1 + H1 * H2_PAD + H2_PAD * out_c) * dsize
        + (H1 + H2_PAD + out_c) * 4
    )

    return pl.pallas_call(
        mlp_kernel,
        out_shape=jax.ShapeDtypeStruct((B, out_c), jnp.float32),
        grid_spec=pltpu.PrefetchScalarGridSpec(
            num_scalar_prefetch=0,
            grid=grid,
            in_specs=in_specs,
            out_specs=out_spec,
        ),
        compiler_params=pltpu.CompilerParams(
            dimension_semantics=("parallel",),
        ),
        cost_estimate=pl.CostEstimate(
            flops=flops, transcendentals=0, bytes_accessed=bytes_accessed),
    )(x, prep["w1"], prep["b1"], prep["w2"], prep["b2"], prep["w3"], prep["b3"])


def init_params(key, in_c, out_c):
    """Deterministic init mimicking PyTorch Linear default (uniform +/-1/sqrt(fan_in))."""
    ks = jax.random.split(key, 6)

    def lin(kw, kb, fan_in, fan_out):
        bound = 1.0 / jnp.sqrt(jnp.asarray(fan_in, jnp.float32))
        w = jax.random.uniform(kw, (fan_in, fan_out), jnp.float32, -bound, bound)
        b = jax.random.uniform(kb, (1, fan_out), jnp.float32, -bound, bound)
        return w, b

    w1, b1 = lin(ks[0], ks[1], in_c, H1)
    w2, b2 = lin(ks[2], ks[3], H1, H2)
    w3, b3 = lin(ks[4], ks[5], H2, out_c)
    return {"w1": w1, "b1": b1, "w2": w2, "b2": b2, "w3": w3, "b3": b3}


def net_forward_ref(x, p):
    h1 = jnp.maximum(x @ p["w1"] + p["b1"], 0.0)
    h2 = jnp.maximum(h1 @ p["w2"] + p["b2"], 0.0)
    return h2 @ p["w3"] + p["b3"]


if __name__ == "__main__":
    key = jax.random.PRNGKey(0)
    k_param, k_x, k_x2 = jax.random.split(key, 3)

    batch, in_c, out_c = 8, 4, 2  # CartPole-like DQN: 4 state dims, 2 actions
    params = init_params(k_param, in_c, out_c)
    x = jax.random.normal(k_x, (batch, in_c), jnp.float32)
    ref = net_forward_ref(x, params)

    # One-time weight preparation (padding + casts hoisted out of the forward).
    prep_f32 = jax.block_until_ready(prepare_params(params, dot_dtype=jnp.float32))
    prep_bf16 = jax.block_until_ready(prepare_params(params, dot_dtype=jnp.bfloat16))

    # 1) Exact-arithmetic path (f32 dot operands): tight tolerance.
    out_f32 = jax.block_until_ready(net_forward(x, prep_f32))
    assert out_f32.shape == (batch, out_c)
    assert jnp.allclose(out_f32, ref, atol=1e-5, rtol=1e-5), "f32 path mismatch"

    # 2) Default perf path (bf16 dot operands, f32 accumulate): looser tolerance.
    # Note: bf16 dots lose mantissa on Q-values; near-tied actions may flip
    # argmax vs f32 — use the f32 path if that matters.
    out_bf16 = jax.block_until_ready(net_forward(x, prep_bf16))
    assert out_bf16.shape == (batch, out_c)
    assert jnp.allclose(out_bf16, ref, atol=5e-2, rtol=5e-2), "bf16 path mismatch"

    # 3) Batch-tiled path with a tile that does NOT divide B (partial last block).
    B2 = 1000
    x2 = jax.random.normal(k_x2, (B2, in_c), jnp.float32)
    ref2 = net_forward_ref(x2, params)
    out2 = jax.block_until_ready(net_forward(x2, prep_f32, batch_tile=256))
    assert out2.shape == (B2, out_c)
    assert jnp.allclose(out2, ref2, atol=1e-5, rtol=1e-5), "tiled path mismatch"

    # 4) Default tile policy on the same non-multiple batch (grid of 4 steps).
    out3 = jax.block_until_ready(net_forward(x2, prep_f32))
    assert jnp.allclose(out3, ref2, atol=1e-5, rtol=1e-5), "auto-tile path mismatch"

    print("KERNEL_OK")
</pallas_src>

<mosaic_0001>
module attributes {stable_mosaic.version = 11 : i64} {
  func.func @mlp_kernel(%arg0: i32, %arg1: memref<8x4xf32, #tpu.memory_space<vmem>>, %arg2: memref<4x128xf32, #tpu.memory_space<vmem>>, %arg3: memref<1x128xf32, #tpu.memory_space<vmem>>, %arg4: memref<128x128xf32, #tpu.memory_space<vmem>>, %arg5: memref<1x128xf32, #tpu.memory_space<vmem>>, %arg6: memref<128x2xf32, #tpu.memory_space<vmem>>, %arg7: memref<1x2xf32, #tpu.memory_space<vmem>>, %arg8: memref<8x2xf32, #tpu.memory_space<vmem>>) attributes {dimension_semantics = [#tpu.dimension_semantics<parallel>], iteration_bounds = array<i64: 1>, scalar_prefetch = 0 : i64, scratch_operands = 0 : i64, tpu.core_type = #tpu.core_type<tc>, window_params = [{transform_indices = @transform_0, window_bounds = array<i64: 8, 4>}, {pipeline_mode = #tpu.pipeline_mode<synchronous>, transform_indices = @transform_1, window_bounds = array<i64: 4, 128>}, {pipeline_mode = #tpu.pipeline_mode<synchronous>, transform_indices = @transform_2, window_bounds = array<i64: 1, 128>}, {pipeline_mode = #tpu.pipeline_mode<synchronous>, transform_indices = @transform_3, window_bounds = array<i64: 128, 128>}, {pipeline_mode = #tpu.pipeline_mode<synchronous>, transform_indices = @transform_4, window_bounds = array<i64: 1, 128>}, {pipeline_mode = #tpu.pipeline_mode<synchronous>, transform_indices = @transform_5, window_bounds = array<i64: 128, 2>}, {pipeline_mode = #tpu.pipeline_mode<synchronous>, transform_indices = @transform_6, window_bounds = array<i64: 1, 2>}, {transform_indices = @transform_7, window_bounds = array<i64: 8, 2>}]} {
    %c0 = arith.constant 0 : index
    %c0_0 = arith.constant 0 : index
    %0 = vector.load %arg1[%c0, %c0_0] : memref<8x4xf32, #tpu.memory_space<vmem>>, vector<8x4xf32>
    %c0_1 = arith.constant 0 : index
    %c0_2 = arith.constant 0 : index
    %1 = vector.load %arg2[%c0_1, %c0_2] : memref<4x128xf32, #tpu.memory_space<vmem>>, vector<4x128xf32>
    %cst = arith.constant dense<0.000000e+00> : vector<8x128xf32>
    %2 = tpu.matmul %0, %1, %cst {dimension_numbers = #tpu.dot_dimension_numbers<[1], [0], [0], [1], [0, 0, 1, 1], [], []>} : vector<8x4xf32>, vector<4x128xf32>, vector<8x128xf32> -> vector<8x128xf32>
    %c0_3 = arith.constant 0 : index
    %c0_4 = arith.constant 0 : index
    %3 = vector.load %arg3[%c0_3, %c0_4] : memref<1x128xf32, #tpu.memory_space<vmem>>, vector<1x128xf32>
    %4 = vector.broadcast %3 : vector<1x128xf32> to vector<8x128xf32>
    %5 = arith.addf %2, %4 : vector<8x128xf32>
    %cst_5 = arith.constant 0.000000e+00 : f32
    %6 = vector.broadcast %cst_5 : f32 to vector<8x128xf32>
    %7 = arith.maximumf %5, %6 : vector<8x128xf32>
    %c0_6 = arith.constant 0 : index
    %c0_7 = arith.constant 0 : index
    %8 = vector.load %arg4[%c0_6, %c0_7] : memref<128x128xf32, #tpu.memory_space<vmem>>, vector<128x128xf32>
    %cst_8 = arith.constant dense<0.000000e+00> : vector<8x128xf32>
    %9 = tpu.matmul %7, %8, %cst_8 {dimension_numbers = #tpu.dot_dimension_numbers<[1], [0], [0], [1], [0, 0, 1, 1], [], []>} : vector<8x128xf32>, vector<128x128xf32>, vector<8x128xf32> -> vector<8x128xf32>
    %c0_9 = arith.constant 0 : index
    %c0_10 = arith.constant 0 : index
    %10 = vector.load %arg5[%c0_9, %c0_10] : memref<1x128xf32, #tpu.memory_space<vmem>>, vector<1x128xf32>
    %11 = vector.broadcast %10 : vector<1x128xf32> to vector<8x128xf32>
    %12 = arith.addf %9, %11 : vector<8x128xf32>
    %cst_11 = arith.constant 0.000000e+00 : f32
    %13 = vector.broadcast %cst_11 : f32 to vector<8x128xf32>
    %14 = arith.maximumf %12, %13 : vector<8x128xf32>
    %c0_12 = arith.constant 0 : index
    %c0_13 = arith.constant 0 : index
    %15 = vector.load %arg6[%c0_12, %c0_13] : memref<128x2xf32, #tpu.memory_space<vmem>>, vector<128x2xf32>
    %cst_14 = arith.constant dense<0.000000e+00> : vector<8x2xf32>
    %16 = tpu.matmul %14, %15, %cst_14 {dimension_numbers = #tpu.dot_dimension_numbers<[1], [0], [0], [1], [0, 0, 1, 1], [], []>} : vector<8x128xf32>, vector<128x2xf32>, vector<8x2xf32> -> vector<8x2xf32>
    %c0_15 = arith.constant 0 : index
    %c0_16 = arith.constant 0 : index
    %17 = vector.load %arg7[%c0_15, %c0_16] : memref<1x2xf32, #tpu.memory_space<vmem>>, vector<1x2xf32>
    %18 = vector.broadcast %17 : vector<1x2xf32> to vector<8x2xf32>
    %19 = arith.addf %16, %18 : vector<8x2xf32>
    %c0_17 = arith.constant 0 : index
    %c0_18 = arith.constant 0 : index
    %20 = vector.load %arg8[%c0_17, %c0_18] : memref<8x2xf32, #tpu.memory_space<vmem>>, vector<8x2xf32>
    tpu.vector_store %arg8[%c0_17, %c0_18], %19 {strides = array<i32>} : memref<8x2xf32, #tpu.memory_space<vmem>>, vector<8x2xf32>,
    return
  }
  func.func @transform_0(%arg0: i32) -> (i32, i32) {
    %c0_i32 = arith.constant 0 : i32
    %c0_i32_0 = arith.constant 0 : i32
    return %arg0, %c0_i32 : i32, i32
  }
  func.func @transform_1(%arg0: i32) -> (i32, i32) {
    %c0_i32 = arith.constant 0 : i32
    %c0_i32_0 = arith.constant 0 : i32
    %c0_i32_1 = arith.constant 0 : i32
    return %c0_i32, %c0_i32_0 : i32, i32
  }
  func.func @transform_2(%arg0: i32) -> (i32, i32) {
    %c0_i32 = arith.constant 0 : i32
    %c0_i32_0 = arith.constant 0 : i32
    %c0_i32_1 = arith.constant 0 : i32
    return %c0_i32, %c0_i32_0 : i32, i32
  }
  func.func @transform_3(%arg0: i32) -> (i32, i32) {
    %c0_i32 = arith.constant 0 : i32
    %c0_i32_0 = arith.constant 0 : i32
    %c0_i32_1 = arith.constant 0 : i32
    return %c0_i32, %c0_i32_0 : i32, i32
  }
  func.func @transform_4(%arg0: i32) -> (i32, i32) {
    %c0_i32 = arith.constant 0 : i32
    %c0_i32_0 = arith.constant 0 : i32
    %c0_i32_1 = arith.constant 0 : i32
    return %c0_i32, %c0_i32_0 : i32, i32
  }
  func.func @transform_5(%arg0: i32) -> (i32, i32) {
    %c0_i32 = arith.constant 0 : i32
    %c0_i32_0 = arith.constant 0 : i32
    %c0_i32_1 = arith.constant 0 : i32
    return %c0_i32, %c0_i32_0 : i32, i32
  }
  func.func @transform_6(%arg0: i32) -> (i32, i32) {
    %c0_i32 = arith.constant 0 : i32
    %c0_i32_0 = arith.constant 0 : i32
    %c0_i32_1 = arith.constant 0 : i32
    return %c0_i32, %c0_i32_0 : i32, i32
  }
  func.func @transform_7(%arg0: i32) -> (i32, i32) {
    %c0_i32 = arith.constant 0 : i32
    %c0_i32_0 = arith.constant 0 : i32
    return %arg0, %c0_i32 : i32, i32
  }
}

</mosaic_0001>

<bundles_post_ra>
// kernel: tpu_custom_call.1
= control target key start
LH: loop header
LB: loop body
LE: loop exit
PB: predicated region body
PF: predicated region fallthrough
CT: control target
= control target key end

     0   :  { %vm39_vm0 = vcmask 1043456   ;;  %vm35_vm1 = vcmask 31744   ;;  %v474_v0 = vmov 0.0   ;;  %vm475_vm2 = vmmov 0   ;;  %s647_s1 = inlined_call_operand.vmem [shape: f32[4,128], index: 1, kind: input, shape index: {}]   ;;  %s648_s0 = inlined_call_operand.vmem [shape: f32[8,4], index: 0, kind: input, shape index: {}]   ;;  %s649_s3 = inlined_call_operand.vmem [shape: f32[128,128], index: 3, kind: input, shape index: {}]   ;;  %s650_s5 = inlined_call_operand.vmem [shape: f32[128,2], index: 5, kind: input, shape index: {}]   ;;  %s651_s2 = inlined_call_operand.vmem [shape: f32[1,128], index: 2, kind: input, shape index: {}]   ;;  %s652_s4 = inlined_call_operand.vmem [shape: f32[1,128], index: 4, kind: input, shape index: {}]   ;;  %s653_s6 = inlined_call_operand.vmem [shape: f32[1,2], index: 6, kind: input, shape index: {}]   ;;  %s654_s7 = inlined_call_operand.vmem [shape: f32[8,2], index: 7, kind: output, shape index: {}]  }
   0x1   :  { %348 = vmatprep.subr.mxu0 %v474_v0  ;;  %v27_v1 = vld [vmem:[%s647_s1] sm:$0xf]  ;;  %350 = vmatprep.mubr.msk.f32.mxu0 %vm475_vm2, %v474_v0  ;;  %v476_v4 = vmov 0.0|0.0   ;;  %v115_v5 = vld [vmem:[%s649_s3 + $0x8] sm:$0xff]  ;;  %v116_v6 = vld [vmem:[%s649_s3 + $0x10] sm:$0xff]  ;;  %vm301_vm3 = vcmask 15360  }
   0x2   :  { %v26_v2 = vld [vmem:[%s648_s0] sm:$0xff]  ;;  %349 = vmatpush3.msk.msra.mxu0 %vm39_vm0, %v27_v1  ;;  %423 = vmatprep.subr.bf16.mxu1 %v476_v4  ;;  %v117_v7 = vld [vmem:[%s649_s3 + $0x18] sm:$0xff]  ;;  %v119_v11 = vld [vmem:[%s649_s3 + $0x28] sm:$0xff] }
   0x3   :  { %v114_v3 = vld [vmem:[%s649_s3] sm:$0xff]  ;;  %351 = vmatmul.mubr.msk.f32.vlgmr.msra.gmra.mrb[0].mxu0 %vm35_vm1, %v26_v2  ;;  %385 = vmatprep.mubr.msk.f32.mxu1 %vm475_vm2, %v474_v0  ;;  %v427_v9 = vpack.c.bf16 %v117_v7, %v116_v6  ;;  %v120_v13 = vld [vmem:[%s649_s3 + $0x30] sm:$0xff]  ;;  %v121_v14 = vld [vmem:[%s649_s3 + $0x38] sm:$0xff] }
   0x4   :  { %v424_v8 = vpack.c.bf16 %v115_v5, %v114_v3  ;;  %447 = vmatprep.subr.bf16.mxu0 %v476_v4  ;;  %420 = vmatprep.mubr.msk.f32.mxu0 %vm475_vm2, %v474_v0  ;;  %v118_v10 = vld [vmem:[%s649_s3 + $0x20] sm:$0xff]  ;;  %v433_v15 = vpack.c.bf16 %v121_v14, %v120_v13  ;;  %v123_v17 = vld [vmem:[%s649_s3 + $0x48] sm:$0xff]  ;;  %v124_v19 = vld [vmem:[%s649_s3 + $0x50] sm:$0xff] }
   0x5   :  { %v430_v12 = vpack.c.bf16 %v119_v11, %v118_v10  ;;  %v122_v16 = vld [vmem:[%s649_s3 + $0x40] sm:$0xff]  ;;  %v125_v20 = vld [vmem:[%s649_s3 + $0x58] sm:$0xff]  ;;  %v127_v23 = vld [vmem:[%s649_s3 + $0x68] sm:$0xff] }
   0x6   :  { %425 = vmatpush3.bf16.msra.mxu1 %v424_v8  ;;  %v436_v18 = vpack.c.bf16 %v123_v17, %v122_v16  ;;  %v439_v21 = vpack.c.bf16 %v125_v20, %v124_v19  ;;  %v126_v22 = vld [vmem:[%s649_s3 + $0x60] sm:$0xff]  ;;  %v128_v25 = vld [vmem:[%s649_s3 + $0x70] sm:$0xff]  ;;  %v129_v26 = vld [vmem:[%s649_s3 + $0x78] sm:$0xff] }
   0x7   :  { %426 = vmatprep.subr.bf16.mxu1 %v476_v4  ;;  %v442_v24 = vpack.c.bf16 %v127_v23, %v126_v22  ;;  %v445_v27 = vpack.c.bf16 %v129_v26, %v128_v25  ;;  %v208_v28 = vld [vmem:[%s650_s5] sm:$0xff]  ;;  %v209_v29 = vld [vmem:[%s650_s5 + $0x8] sm:$0xff]  ;;  %v210_v30 = vld [vmem:[%s650_s5 + $0x10] sm:$0xff] }
   0x8   :  { %v448_v31 = vpack.c.bf16 %v209_v29, %v208_v28  ;;  %v211_v32 = vld [vmem:[%s650_s5 + $0x18] sm:$0xff]  ;;  %v212_v34 = vld [vmem:[%s650_s5 + $0x20] sm:$0xff]  ;;  %v213_v35 = vld [vmem:[%s650_s5 + $0x28] sm:$0xff] }
   0x9   :  { %v451_v33 = vpack.c.bf16 %v211_v32, %v210_v30  ;;  %v454_v36 = vpack.c.bf16 %v213_v35, %v212_v34  ;;  %v214_v37 = vld [vmem:[%s650_s5 + $0x30] sm:$0xff]  ;;  %v215_v38 = vld [vmem:[%s650_s5 + $0x38] sm:$0xff]  ;;  %v216_v40 = vld [vmem:[%s650_s5 + $0x40] sm:$0xff] }
   0xa   :  { %428 = vmatpush3.bf16.msra.mxu1 %v427_v9  ;;  %449 = vmatpush3.bf16.msra.mxu0 %v448_v31  ;;  %v457_v39 = vpack.c.bf16 %v215_v38, %v214_v37  ;;  %v217_v41 = vld [vmem:[%s650_s5 + $0x48] sm:$0xff]  ;;  %v218_v43 = vld [vmem:[%s650_s5 + $0x50] sm:$0xff]  ;;  %v219_v44 = vld [vmem:[%s650_s5 + $0x58] sm:$0xff] }
   0xb   :  { %429 = vmatprep.subr.bf16.mxu1 %v476_v4  ;;  %450 = vmatprep.subr.bf16.mxu0 %v476_v4  ;;  %v460_v42 = vpack.c.bf16 %v217_v41, %v216_v40  ;;  %v463_v45 = vpack.c.bf16 %v219_v44, %v218_v43  ;;  %v220_v46 = vld [vmem:[%s650_s5 + $0x60] sm:$0xff]  ;;  %v221_v47 = vld [vmem:[%s650_s5 + $0x68] sm:$0xff]  ;;  %v222_v54 = vld [vmem:[%s650_s5 + $0x70] sm:$0xff] }
   0xc   :  { %v466_v48 = vpack.c.bf16 %v221_v47, %v220_v46  ;;  %v307_v49 = vld [vmem:[%s651_s2] ss:$0 sm:$0xff]  ;;  %v223_v55 = vld [vmem:[%s650_s5 + $0x78] sm:$0xff] }
   0xd   :  { %v469_v56 = vpack.c.bf16 %v223_v55, %v222_v54  ;;  %v310_v57 = vld [vmem:[%s652_s4] ss:$0 sm:$0xff] }
   0xe   :  { %431 = vmatpush3.bf16.msra.mxu1 %v430_v12  ;;  %452 = vmatpush3.bf16.msra.mxu0 %v451_v33  ;;  %v311_v62 = vld [vmem:[%s653_s6] ss:$0 sm:$0xff] }
   0xf   :  { %432 = vmatprep.subr.bf16.mxu1 %v476_v4  ;;  %453 = vmatprep.subr.bf16.mxu0 %v476_v4 }
  0x12   :  { %434 = vmatpush3.bf16.msra.mxu1 %v433_v15  ;;  %455 = vmatpush3.bf16.msra.mxu0 %v454_v36 }
  0x13   :  { %435 = vmatprep.subr.bf16.mxu1 %v476_v4  ;;  %456 = vmatprep.subr.bf16.mxu0 %v476_v4 }
  0x16   :  { %437 = vmatpush3.bf16.msra.mxu1 %v436_v18  ;;  %458 = vmatpush3.bf16.msra.mxu0 %v457_v39 }
  0x17   :  { %438 = vmatprep.subr.bf16.mxu1 %v476_v4  ;;  %459 = vmatprep.subr.bf16.mxu0 %v476_v4 }
  0x1a   :  { %440 = vmatpush3.bf16.msra.mxu1 %v439_v21  ;;  %461 = vmatpush3.bf16.msra.mxu0 %v460_v42 }
  0x1b   :  { %441 = vmatprep.subr.bf16.mxu1 %v476_v4  ;;  %462 = vmatprep.subr.bf16.mxu0 %v476_v4 }
  0x1e   :  { %443 = vmatpush3.bf16.msra.mxu1 %v442_v24  ;;  %464 = vmatpush3.bf16.msra.mxu0 %v463_v45 }
  0x1f   :  { %444 = vmatprep.subr.bf16.mxu1 %v476_v4  ;;  %465 = vmatprep.subr.bf16.mxu0 %v476_v4 }
  0x22   :  { %446 = vmatpush3.bf16.msra.mxu1 %v445_v27  ;;  %467 = vmatpush3.bf16.msra.mxu0 %v466_v48 }
  0x23   :  { %468 = vmatprep.subr.bf16.mxu0 %v476_v4 }
  0x26   :  { %470 = vmatpush3.bf16.msra.mxu0 %v469_v56 }
  0xd6   :  { %v109_v50 = vpop.f32.mrb[0].mxu0 }
  0xd7   :  { %v110_v51 = vadd.f32 %v307_v49, %v109_v50  ;;  %v352_v52 = vpop.f32.mrb[1].mxu0 }
  0xd9   :  { %v113_v53 = vmax.f32 %v110_v51, 0.0 }
  0xdb   :  { %386 = vmatmul.mubr.f32.vlgmr.msra.gmra.mrb[0].mxu1 %v113_v53 }
 0x1ae   :  { %v203_v58 = vpop.f32.mrb[0].mxu1 }
 0x1af   :  { %v204_v59 = vadd.f32 %v310_v57, %v203_v58  ;;  %v387_v60 = vpop.f32.mrb[1].mxu1 }
 0x1b1   :  { %v207_v61 = vmax.f32 %v204_v59, 0.0 }
 0x1b3   :  { %421 = vmatmul.mubr.f32.vlgmr.msra.gmra.mrb[2].mxu0 %v207_v61 }
 0x286   :  { %v297_v63 = vpop.f32.mrb[2].mxu0 }
 0x287   :  { %v298_v0 = vadd.f32 %v311_v62, %v297_v63  ;;  %v422_v1 = vpop.f32.mrb[3].mxu0 }
 0x289   :  { %302 = vst.msk [vmem:[%s654_s7] sm:$0xff] %vm301_vm3, %v298_v0 }

</bundles_post_ra>
